<compile_context>
chip_gen: v7x
topology: tpu7x:2x2x1
jax: 0.10.0
libtpu: 0.0.40
codegen_flags: <defaults>
</compile_context>

<pallas_src>
import functools

import jax
import jax.numpy as jnp
from jax.experimental import pallas as pl
from jax.experimental.pallas import tpu as pltpu

# ------------------------------- configuration -------------------------------
B = 2          # batch
C_IN = 4       # in_planes
IM = 16        # spatial size
OC = 32        # out_planes
K = 3          # kernel_size
STRIDE = 1
PAD = 1
EPS = 1e-5

LANES = 128
SUBLANES = 8
TILE_M = 256   # output-row tile (bounds VMEM, gives >=2 parallel steps here)


def _round_up(v, m):
    return (v + m - 1) // m * m


# ------------------------------- Pallas kernel -------------------------------
def _conv_bn_relu_kernel(p_ref, w_ref, shift_ref, o_ref):
    """One lane-dense matmul tile of fused Conv2d + folded-BN + ReLU.

    p_ref:     (TM, KP)   bf16 im2col patch rows (lane-dense contraction dim)
    w_ref:     (KP, OCP)  bf16 conv weight with BN scale pre-folded in
    shift_ref: (1, OCP)   f32 folded BN shift (beta - mean * scale)
    o_ref:     (TM, OCP)  f32 output rows (channel padding sliced off outside)
    """
    acc = jnp.dot(p_ref[...], w_ref[...], preferred_element_type=jnp.float32)
    o_ref[...] = jnp.maximum(acc + shift_ref[...], 0.0).astype(o_ref.dtype)


# --------------------------------- wrapper ------------------------------------
def basic_conv_forward(x_nchw, w_oihw, gamma, beta, run_mean, run_var,
                       *, stride, padding, eps, tile_m=TILE_M):
    b, c_in, h, w = x_nchw.shape
    oc, _, k, _ = w_oihw.shape
    ho = (h + 2 * padding - k) // stride + 1
    wo = (w + 2 * padding - k) // stride + 1

    kk_c = k * k * c_in
    kp = _round_up(kk_c, LANES)          # padded contraction dim (36 -> 128)
    ocp = _round_up(oc, LANES)           # padded output channels (32 -> 128)

    # NCHW -> NHWC once at the boundary, zero-pad spatially (conv padding).
    x = jnp.transpose(x_nchw, (0, 2, 3, 1))
    x = jnp.pad(x, ((0, 0), (padding, padding), (padding, padding), (0, 0)))

    # Wrapper-side im2col: (B*Ho*Wo, k*k*C) lane-dense patch matrix.
    cols = []
    for kh in range(k):
        for kw in range(k):
            cols.append(
                x[:, kh:kh + (ho - 1) * stride + 1:stride,
                     kw:kw + (wo - 1) * stride + 1:stride, :])
    patch = jnp.concatenate(cols, axis=-1).reshape(b * ho * wo, kk_c)

    m = b * ho * wo
    tm = min(tile_m, _round_up(m, SUBLANES))
    mp = _round_up(m, tm)
    patch = jnp.pad(patch, ((0, mp - m), (0, kp - kk_c))).astype(jnp.bfloat16)

    # Fold eval-mode BatchNorm: scale goes into the weights, shift stays as an
    # epilogue add.  Weight rows ordered (kh, kw, c) to match the patch columns.
    scale = gamma / jnp.sqrt(run_var + eps)
    shift = beta - run_mean * scale
    w2d = jnp.transpose(w_oihw, (2, 3, 1, 0)).reshape(kk_c, oc)
    w2d = w2d * scale[None, :]
    w2d = jnp.pad(w2d, ((0, kp - kk_c), (0, ocp - oc))).astype(jnp.bfloat16)
    shift_p = jnp.pad(shift, (0, ocp - oc)).reshape(1, ocp).astype(jnp.float32)

    grid_m = mp // tm
    out = pl.pallas_call(
        _conv_bn_relu_kernel,
        out_shape=jax.ShapeDtypeStruct((mp, ocp), jnp.float32),
        grid=(grid_m,),
        in_specs=[
            pl.BlockSpec((tm, kp), lambda i: (i, 0)),     # patch row-tile
            pl.BlockSpec((kp, ocp), lambda i: (0, 0)),    # folded weight (resident)
            pl.BlockSpec((1, ocp), lambda i: (0, 0)),     # BN shift (resident)
        ],
        out_specs=pl.BlockSpec((tm, ocp), lambda i: (i, 0)),
        compiler_params=pltpu.CompilerParams(
            dimension_semantics=("parallel",)),
    )(patch, w2d, shift_p)

    # Drop row/channel padding, back to NCHW (layout plumbing only, no compute).
    out = out[:m, :oc].reshape(b, ho, wo, oc)
    return jnp.transpose(out, (0, 3, 1, 2))


# ------------------------------ pure-JAX references ---------------------------
def basic_conv_reference_f32(x_nchw, w_oihw, gamma, beta, run_mean, run_var,
                             *, stride, padding, eps):
    """Full-f32 reference (matches the PyTorch module numerics)."""
    y = jax.lax.conv_general_dilated(
        x_nchw, w_oihw,
        window_strides=(stride, stride),
        padding=[(padding, padding), (padding, padding)],
        dimension_numbers=("NCHW", "OIHW", "NCHW"),
        precision=jax.lax.Precision.HIGHEST,
    )
    scale = gamma / jnp.sqrt(run_var + eps)
    shift = beta - run_mean * scale
    y = y * scale[None, :, None, None] + shift[None, :, None, None]
    return jnp.maximum(y, 0.0)


def basic_conv_reference_bf16(x_nchw, w_oihw, gamma, beta, run_mean, run_var,
                              *, stride, padding, eps):
    """Structural reference with the same bf16-operand / f32-accum recipe."""
    scale = gamma / jnp.sqrt(run_var + eps)
    shift = beta - run_mean * scale
    wf = (w_oihw * scale[:, None, None, None]).astype(jnp.bfloat16)
    y = jax.lax.conv_general_dilated(
        x_nchw.astype(jnp.bfloat16), wf,
        window_strides=(stride, stride),
        padding=[(padding, padding), (padding, padding)],
        dimension_numbers=("NCHW", "OIHW", "NCHW"),
        preferred_element_type=jnp.float32,
    )
    y = y + shift[None, :, None, None]
    return jnp.maximum(y, 0.0)


if __name__ == "__main__":
    key = jax.random.PRNGKey(0)
    kx, kw, kg, kb, km, kv = jax.random.split(key, 6)

    x = jax.random.normal(kx, (B, C_IN, IM, IM), jnp.float32)      # NCHW like PyTorch
    w = jax.random.normal(kw, (OC, C_IN, K, K), jnp.float32) * 0.1
    gamma = jax.random.uniform(kg, (OC,), jnp.float32, 0.5, 1.5)
    beta = jax.random.normal(kb, (OC,), jnp.float32) * 0.1
    run_mean = jax.random.normal(km, (OC,), jnp.float32) * 0.1
    run_var = jax.random.uniform(kv, (OC,), jnp.float32, 0.5, 1.5)

    fwd = jax.jit(functools.partial(basic_conv_forward,
                                    stride=STRIDE, padding=PAD, eps=EPS))
    out = jax.block_until_ready(fwd(x, w, gamma, beta, run_mean, run_var))

    ho = (IM + 2 * PAD - K) // STRIDE + 1
    assert out.shape == (B, OC, ho, ho), out.shape

    # Structural check: same bf16-operand / f32-accumulation recipe.
    ref_bf16 = basic_conv_reference_bf16(x, w, gamma, beta, run_mean, run_var,
                                         stride=STRIDE, padding=PAD, eps=EPS)
    err_struct = float(jnp.max(jnp.abs(out - ref_bf16)))
    assert err_struct < 3e-2, f"structural max abs error {err_struct}"

    # Module-level check vs the full-f32 reference (loosened for bf16 MXU operands).
    ref_f32 = basic_conv_reference_f32(x, w, gamma, beta, run_mean, run_var,
                                       stride=STRIDE, padding=PAD, eps=EPS)
    err_f32 = float(jnp.max(jnp.abs(out - ref_f32)))
    assert err_f32 < 1e-1, f"module max abs error {err_f32}"

    print("KERNEL_OK")
</pallas_src>

<mosaic_0001>
module attributes {stable_mosaic.version = 11 : i64} {
  func.func @_conv_bn_relu_kernel(%arg0: i32, %arg1: memref<256x128xbf16, #tpu.memory_space<vmem>>, %arg2: memref<128x128xbf16, #tpu.memory_space<vmem>>, %arg3: memref<1x128xf32, #tpu.memory_space<vmem>>, %arg4: memref<256x128xf32, #tpu.memory_space<vmem>>) attributes {dimension_semantics = [#tpu.dimension_semantics<parallel>], iteration_bounds = array<i64: 2>, scalar_prefetch = 0 : i64, scratch_operands = 0 : i64, tpu.core_type = #tpu.core_type<tc>, window_params = [{transform_indices = @transform_0, window_bounds = array<i64: 256, 128>}, {pipeline_mode = #tpu.pipeline_mode<synchronous>, transform_indices = @transform_1, window_bounds = array<i64: 128, 128>}, {pipeline_mode = #tpu.pipeline_mode<synchronous>, transform_indices = @transform_2, window_bounds = array<i64: 1, 128>}, {transform_indices = @transform_3, window_bounds = array<i64: 256, 128>}]} {
    %c0 = arith.constant 0 : index
    %c0_0 = arith.constant 0 : index
    %0 = vector.load %arg1[%c0, %c0_0] : memref<256x128xbf16, #tpu.memory_space<vmem>>, vector<256x128xbf16>
    %c0_1 = arith.constant 0 : index
    %c0_2 = arith.constant 0 : index
    %1 = vector.load %arg2[%c0_1, %c0_2] : memref<128x128xbf16, #tpu.memory_space<vmem>>, vector<128x128xbf16>
    %cst = arith.constant dense<0.000000e+00> : vector<256x128xf32>
    %2 = tpu.matmul %0, %1, %cst {dimension_numbers = #tpu.dot_dimension_numbers<[1], [0], [0], [1], [0, 0, 1, 1], [], []>} : vector<256x128xbf16>, vector<128x128xbf16>, vector<256x128xf32> -> vector<256x128xf32>
    %c0_3 = arith.constant 0 : index
    %c0_4 = arith.constant 0 : index
    %3 = vector.load %arg3[%c0_3, %c0_4] : memref<1x128xf32, #tpu.memory_space<vmem>>, vector<1x128xf32>
    %4 = vector.broadcast %3 : vector<1x128xf32> to vector<256x128xf32>
    %5 = arith.addf %2, %4 : vector<256x128xf32>
    %cst_5 = arith.constant 0.000000e+00 : f32
    %6 = vector.broadcast %cst_5 : f32 to vector<256x128xf32>
    %7 = arith.maximumf %5, %6 : vector<256x128xf32>
    %c0_6 = arith.constant 0 : index
    %c0_7 = arith.constant 0 : index
    %8 = vector.load %arg4[%c0_6, %c0_7] : memref<256x128xf32, #tpu.memory_space<vmem>>, vector<256x128xf32>
    tpu.vector_store %arg4[%c0_6, %c0_7], %7 {strides = array<i32>} : memref<256x128xf32, #tpu.memory_space<vmem>>, vector<256x128xf32>,
    return
  }
  func.func @transform_0(%arg0: i32) -> (i32, i32) {
    %c0_i32 = arith.constant 0 : i32
    %c0_i32_0 = arith.constant 0 : i32
    return %arg0, %c0_i32 : i32, i32
  }
  func.func @transform_1(%arg0: i32) -> (i32, i32) {
    %c0_i32 = arith.constant 0 : i32
    %c0_i32_0 = arith.constant 0 : i32
    %c0_i32_1 = arith.constant 0 : i32
    return %c0_i32, %c0_i32_0 : i32, i32
  }
  func.func @transform_2(%arg0: i32) -> (i32, i32) {
    %c0_i32 = arith.constant 0 : i32
    %c0_i32_0 = arith.constant 0 : i32
    %c0_i32_1 = arith.constant 0 : i32
    return %c0_i32, %c0_i32_0 : i32, i32
  }
  func.func @transform_3(%arg0: i32) -> (i32, i32) {
    %c0_i32 = arith.constant 0 : i32
    %c0_i32_0 = arith.constant 0 : i32
    return %arg0, %c0_i32 : i32, i32
  }
}

</mosaic_0001>

<bundles_post_ra>
// kernel: basic_conv_forward.1
= control target key start
LH: loop header
LB: loop body
LE: loop exit
PB: predicated region body
PF: predicated region fallthrough
CT: control target
= control target key end

     0   :  { %8 = vsyncpa [#allocation3], 0  ;;  %s1171_s0 = inlined_call_operand.vmem [shape: bf16[512,128], index: 0, kind: input, shape index: {}]   ;;  %s1172_s1 = inlined_call_operand.vmem [shape: bf16[128,128], index: 1, kind: input, shape index: {}]   ;;  %s1173_s2 = inlined_call_operand.vmem [shape: f32[1,128], index: 2, kind: input, shape index: {}]   ;;  %s1174_s3 = inlined_call_operand.hbm [shape: f32[512,128], index: 3, kind: output, shape index: {}]  }
   0x1   :  { %10 = vsyncpa [#allocation3 + $0x1], 0  ;;  %s951_s12 = smov 0   ;;  %s953_s13 = smov 0  }
   0x2   :  { %s955_s14 = smov 0   ;;  %s957_s15 = smov 0  }
   0x3 LB: > { %s972_s16 = sadd.s32 4294967295, %s926_s15   ;;  %s673_s17 = sadd.s32 4294967294, %s926_s15   ;;  %s926_s15 = sphi %s957_s15, %s1180_s15   ;;  %s922_s14 = sphi %s955_s14, %s1179_s14   ;;  %s918_s13 = sphi %s953_s13, %s1178_s13   ;;  %s914_s12 = sphi %s951_s12, %s1177_s12  }
   0x4   : > { %s976_s18 = sadd.s32 1, %s926_s15   ;;  %s91_s19 = sadd.s32 1, %s922_s14 }
   0x5   : > { %s88_s20 = ssub.s32 %s926_s15, %s976_s18  ;;  %p101_p0 = scmp.ne.s32.totalorder %s922_s14, %s918_s13 }
   0x6   : > { %p89_p1 = scmp.eq.s32.totalorder %s88_s20, 0  ;;  %p102_p2 = scmp.eq.s32.totalorder %s972_s16, 1 }
   0x7   : > { %p107_p3 = scmp.ne.s32.totalorder %s918_s13, %s914_s12  ;;  %p108_p4 = scmp.eq.s32.totalorder %s673_s17, 1 }
   0x8   : > { %s987_s21 = scalar_select %p89_p1, %s922_s14, %s91_s19  }
   0x9   : > { %p989_p5 = por %p102_p2, %p101_p0  ;;  %p993_p6 = por %p108_p4, %p107_p3 }
   0xa   : > { %p676_p7 = scmp.ge.s32.totalorder %s926_s15, 1  ;;  %p141_p8 = scmp.lt.s32.totalorder %s926_s15, 3 }
   0xc   : > { %p142_p9 = pnand %p676_p7, %p141_p8 }
   0xd   : > { %v840_v0 = vld [vmem:[%s1172_s1] sm:$0xff] (!%p142_p9)   ;;  %s678_s26 = sshll.u32 (!%p142_p9), %s972_s16, 5  ;;  %v841_v1 = vld [vmem:[%s1172_s1 + $0x8] sm:$0xff] (!%p142_p9)   ;;  %v842_v2 = vld [vmem:[%s1172_s1 + $0x10] sm:$0xff] (!%p142_p9)   ;;  %s162_s27 = sand.u32 (!%p142_p9), 1, %s918_s13  }
   0xe   : > { %145 = sbr.rel (%p142_p9) target bundleno = 304 (0x130), region = 32  ;;  %p166_p10 = scmp.lt.s32.totalorder (!%p142_p9), %s678_s26, 63  ;;  %735 = vmatprep.subr.bf16.mxu0 (!%p142_p9), %v840_v0  ;;  %783 = vmatprep.subr.bf16.mxu1 (!%p142_p9), %v840_v0  ;;  %v843_v3 = vld [vmem:[%s1172_s1 + $0x18] sm:$0xff] (!%p142_p9)   ;;  %v844_v6 = vld [vmem:[%s1172_s1 + $0x20] sm:$0xff] (!%p142_p9)   ;;  %v845_v7 = vld [vmem:[%s1172_s1 + $0x28] sm:$0xff] (!%p142_p9)  }
   0xf   : > { %736 = vmatpush3.bf16.msra.mxu0 (!%p142_p9), %v840_v0  ;;  %791 = vmatpush3.bf16.msra.mxu1 (!%p142_p9), %v840_v0  ;;  %v846_v8 = vld [vmem:[%s1172_s1 + $0x30] sm:$0xff] (!%p142_p9)   ;;  %v847_v9 = vld [vmem:[%s1172_s1 + $0x38] sm:$0xff] (!%p142_p9)   ;;  %v1049_v24 = vld [vmem:[%s1173_s2] ss:$0 sm:$0xff] (!%p142_p9)  ;;  %s677_s30 = sshll.u32 (!%p142_p9), %s162_s27, 8  ;;  %s710_s5 = sshll.u32 (!%p142_p9), %s972_s16, 12 }
  0x10   : > { %737 = vmatprep.subr.bf16.mxu0 (!%p142_p9), %v841_v1  ;;  %784 = vmatprep.subr.bf16.mxu1 (!%p142_p9), %v841_v1  ;;  %s1118_s8 = scalar_lea.hbm (!%p142_p9), %s1174_s3, %s710_s5  ;;  %s1130_s9 = scalar_lea.sflag (!%p142_p9), [#allocation3], %s162_s27 }
  0x11   : > { %s928_s11 = smov (!%p142_p9), [#allocation2]  }
  0x12   : > { %s868_s17 = sshll.u32 (!%p142_p9), %s928_s11, 4  ;;  %s869_s17 = int_to_ptr.vmem [resolvable:$false] %s868_s17 }
  0x13   : > { %738 = vmatpush3.bf16.msra.mxu0 (!%p142_p9), %v841_v1  ;;  %792 = vmatpush3.bf16.msra.mxu1 (!%p142_p9), %v841_v1  ;;  %s870_s19 = scalar_lea.vmem (!%p142_p9), %s869_s17, 8192 }
  0x14   : > { %739 = vmatprep.subr.bf16.mxu0 (!%p142_p9), %v842_v2  ;;  %785 = vmatprep.subr.bf16.mxu1 (!%p142_p9), %v842_v2 }
  0x15   : > { %s1182_s26 = smov (!%p166_p10, %s678_s26), 63 }
  0x16   : > { %s679_s4 = sshll.u32 %s1182_s26, 2 }
  0x17   : > { %s1012_s7 = scalar_lea.vmem %s1171_s0, %s679_s4  ;;  %740 = vmatpush3.bf16.msra.mxu0 %v842_v2  ;;  %793 = vmatpush3.bf16.msra.mxu1 %v842_v2  ;;  %s1061_s4 = scalar_lea.vmem [#allocation2], %s677_s30 }
  0x18   : > { %v848_v4 = vld [vmem:[%s1012_s7] sm:$0xff]   ;;  %741 = vmatprep.subr.bf16.mxu0 %v843_v3  ;;  %786 = vmatprep.subr.bf16.mxu1 %v843_v3  ;;  %v850_v10 = vld [vmem:[%s1012_s7 + $0x8] sm:$0xff]   ;;  %v852_v12 = vld [vmem:[%s1012_s7 + $0x10] sm:$0xff]   ;;  %s611_s6 = sshll.u32 %s1061_s4, 4  ;;  %s1120_s6 = int_to_ptr.vmem [resolvable:$true] %s611_s6 }
  0x19   : > { %v849_v5 = vld [vmem:[%s1012_s7 + $0x40] sm:$0xff]   ;;  %751 = vmatprep.mubr.bf16.mxu0 %v848_v4  ;;  %v851_v11 = vld [vmem:[%s1012_s7 + $0x48] sm:$0xff]   ;;  %v853_v13 = vld [vmem:[%s1012_s7 + $0x50] sm:$0xff]   ;;  %s864_s10 = scalar_lea.vmem %s1120_s6, 4096  ;;  %p871_p0 = scmp.lt.s32.totalorder %s1120_s6, %s869_s17 }
  0x1a   : > { %767 = vmatprep.mubr.bf16.mxu1 %v849_v5  ;;  %v854_v14 = vld [vmem:[%s1012_s7 + $0x18] sm:$0xff]   ;;  %v856_v16 = vld [vmem:[%s1012_s7 + $0x20] sm:$0xff]   ;;  %v858_v18 = vld [vmem:[%s1012_s7 + $0x28] sm:$0xff]   ;;  %p865_p11 = scmp.ne.s32.totalorder %s1120_s6, %s864_s10  ;;  %p872_p1 = scmp.lt.s32.totalorder %s870_s19, %s864_s10 }
  0x1b   : > { %742 = vmatpush3.bf16.msra.mxu0 %v843_v3  ;;  %794 = vmatpush3.bf16.msra.mxu1 %v843_v3  ;;  %v855_v15 = vld [vmem:[%s1012_s7 + $0x58] sm:$0xff]   ;;  %v857_v17 = vld [vmem:[%s1012_s7 + $0x60] sm:$0xff]   ;;  %v859_v19 = vld [vmem:[%s1012_s7 + $0x68] sm:$0xff]  }
  0x1c   : > { %743 = vmatprep.subr.bf16.mxu0 %v844_v6  ;;  %787 = vmatprep.subr.bf16.mxu1 %v844_v6  ;;  %v860_v20 = vld [vmem:[%s1012_s7 + $0x30] sm:$0xff]   ;;  %v862_v22 = vld [vmem:[%s1012_s7 + $0x38] sm:$0xff]   ;;  %p866_p12 = pnand %p865_p11, %p989_p5  ;;  %p873_p2 = por %p872_p1, %p871_p0 }
  0x1d   : > { %v861_v21 = vld [vmem:[%s1012_s7 + $0x70] sm:$0xff]   ;;  %v863_v23 = vld [vmem:[%s1012_s7 + $0x78] sm:$0xff]  }
  0x1e   : > { %p867_p13 = pneg %p866_p12 }
  0x1f   : > { %744 = vmatpush3.bf16.msra.mxu0 %v844_v6  ;;  %795 = vmatpush3.bf16.msra.mxu1 %v844_v6 }
  0x20   : > { %745 = vmatprep.subr.bf16.mxu0 %v845_v7  ;;  %788 = vmatprep.subr.bf16.mxu1 %v845_v7  ;;  %p874_p3 = pnand %p873_p2, %p867_p13 }
  0x23   : > { %746 = vmatpush3.bf16.msra.mxu0 %v845_v7  ;;  %796 = vmatpush3.bf16.msra.mxu1 %v845_v7 }
  0x24   : > { %747 = vmatprep.subr.bf16.mxu0 %v846_v8  ;;  %789 = vmatprep.subr.bf16.mxu1 %v846_v8 }
  0x27   : > { %748 = vmatpush3.bf16.msra.mxu0 %v846_v8  ;;  %797 = vmatpush3.bf16.msra.mxu1 %v846_v8 }
  0x28   : > { %749 = vmatprep.subr.bf16.mxu0 %v847_v9  ;;  %790 = vmatprep.subr.bf16.mxu1 %v847_v9 }
  0x2b   : > { %750 = vmatpush3.bf16.msra.mxu0 %v847_v9  ;;  %798 = vmatpush3.bf16.msra.mxu1 %v847_v9 }
  0x2e   : > { %752 = vmatmul.mubr.bf16.vlgmr.msra.gmra.mrb[0].mxu0 %v850_v10  ;;  %768 = vmatmul.mubr.bf16.vlgmr.msra.gmra.mrb[0].mxu1 %v851_v11 }
  0x2f   : > { %755 = vmatprep.mubr.bf16.mxu0 %v852_v12  ;;  %771 = vmatprep.mubr.bf16.mxu1 %v853_v13 }
  0x36   : > { %756 = vmatmul.mubr.bf16.gmra.mrb[4].mxu0 %v854_v14  ;;  %772 = vmatmul.mubr.bf16.gmra.mrb[4].mxu1 %v855_v15 }
  0x37   : > { %759 = vmatprep.mubr.bf16.mxu0 %v856_v16  ;;  %775 = vmatprep.mubr.bf16.mxu1 %v857_v17 }
  0x3e   : > { %760 = vmatmul.mubr.bf16.gmra.mrb[8].mxu0 %v858_v18  ;;  %776 = vmatmul.mubr.bf16.gmra.mrb[8].mxu1 %v859_v19 }
  0x3f   : > { %763 = vmatprep.mubr.bf16.mxu0 %v860_v20  ;;  %779 = vmatprep.mubr.bf16.mxu1 %v861_v21 }
  0x46   : > { %764 = vmatmul.mubr.bf16.gmra.mrb[12].mxu0 %v862_v22  ;;  %780 = vmatmul.mubr.bf16.gmra.mrb[12].mxu1 %v863_v23 }
 0x101   : > { %v753_v25 = vpop.f32.mrb[0].mxu0  ;;  %v769_v26 = vpop.f32.mrb[0].mxu1 }
 0x102   : > { %v415_v27 = vadd.f32 %v753_v25, %v1049_v24  ;;  %v479_v28 = vadd.f32 %v769_v26, %v1049_v24  ;;  %v406_v29 = vpop.f32.mrb[1].mxu0  ;;  %v470_v30 = vpop.f32.mrb[1].mxu1 }
 0x103   : > { %v407_v31 = vadd.f32 %v1049_v24, %v406_v29  ;;  %v471_v32 = vadd.f32 %v1049_v24, %v470_v30  ;;  %v754_v33 = vpop.f32.mrb[2].mxu0  ;;  %v770_v34 = vpop.f32.mrb[2].mxu1 }
 0x104   : > { %v535_v35 = vmax.f32 %v415_v27, 0.0  ;;  %v551_v36 = vmax.f32 %v479_v28, 0.0  ;;  %v418_v37 = vadd.f32 %v754_v33, %v1049_v24  ;;  %v482_v38 = vadd.f32 %v770_v34, %v1049_v24  ;;  %v409_v39 = vpop.f32.mrb[3].mxu0  ;;  %v473_v40 = vpop.f32.mrb[3].mxu1 }
 0x105   : > { %v533_v41 = vmax.f32 %v407_v31, 0.0  ;;  %v549_v42 = vmax.f32 %v471_v32, 0.0  ;;  %v410_v43 = vadd.f32 %v1049_v24, %v409_v39  ;;  %v474_v44 = vadd.f32 %v1049_v24, %v473_v40 }
 0x106   : > { %567 = vst [vmem:[%s1061_s4 + $0x10] sm:$0xff] %v535_v35  ;;  %583 = vst [vmem:[%s1061_s4 + $0x90] sm:$0xff] %v551_v36  ;;  %v536_v45 = vmax.f32 %v418_v37, 0.0  ;;  %v552_v46 = vmax.f32 %v482_v38, 0.0 }
 0x107   : > { %565 = vst [vmem:[%s1061_s4] sm:$0xff] %v533_v41  ;;  %581 = vst [vmem:[%s1061_s4 + $0x80] sm:$0xff] %v549_v42  ;;  %v534_v47 = vmax.f32 %v410_v43, 0.0  ;;  %v550_v48 = vmax.f32 %v474_v44, 0.0 }
 0x108   : > { %568 = vst [vmem:[%s1061_s4 + $0x18] sm:$0xff] %v536_v45  ;;  %584 = vst [vmem:[%s1061_s4 + $0x98] sm:$0xff] %v552_v46 }
 0x109   : > { %566 = vst [vmem:[%s1061_s4 + $0x8] sm:$0xff] %v534_v47  ;;  %582 = vst [vmem:[%s1061_s4 + $0x88] sm:$0xff] %v550_v48  ;;  %v757_v49 = vpop.f32.mrb[4].mxu0  ;;  %v773_v50 = vpop.f32.mrb[4].mxu1 }
 0x10a   : > { %v431_v51 = vadd.f32 %v757_v49, %v1049_v24  ;;  %v495_v52 = vadd.f32 %v773_v50, %v1049_v24  ;;  %v422_v53 = vpop.f32.mrb[5].mxu0  ;;  %v486_v54 = vpop.f32.mrb[5].mxu1 }
 0x10b   : > { %v423_v55 = vadd.f32 %v1049_v24, %v422_v53  ;;  %v487_v56 = vadd.f32 %v1049_v24, %v486_v54  ;;  %v758_v57 = vpop.f32.mrb[6].mxu0  ;;  %v774_v58 = vpop.f32.mrb[6].mxu1 }
 0x10c   : > { %v539_v59 = vmax.f32 %v431_v51, 0.0  ;;  %v555_v60 = vmax.f32 %v495_v52, 0.0  ;;  %v434_v61 = vadd.f32 %v758_v57, %v1049_v24  ;;  %v498_v62 = vadd.f32 %v774_v58, %v1049_v24  ;;  %v425_v63 = vpop.f32.mrb[7].mxu0  ;;  %v489_v0 = vpop.f32.mrb[7].mxu1 }
 0x10d   : > { %v537_v1 = vmax.f32 %v423_v55, 0.0  ;;  %v553_v2 = vmax.f32 %v487_v56, 0.0  ;;  %v426_v3 = vadd.f32 %v1049_v24, %v425_v63  ;;  %v490_v4 = vadd.f32 %v1049_v24, %v489_v0 }
 0x10e   : > { %571 = vst [vmem:[%s1061_s4 + $0x30] sm:$0xff] %v539_v59  ;;  %587 = vst [vmem:[%s1061_s4 + $0xb0] sm:$0xff] %v555_v60  ;;  %v540_v5 = vmax.f32 %v434_v61, 0.0  ;;  %v556_v6 = vmax.f32 %v498_v62, 0.0 }
 0x10f   : > { %569 = vst [vmem:[%s1061_s4 + $0x20] sm:$0xff] %v537_v1  ;;  %585 = vst [vmem:[%s1061_s4 + $0xa0] sm:$0xff] %v553_v2  ;;  %v538_v7 = vmax.f32 %v426_v3, 0.0  ;;  %v554_v8 = vmax.f32 %v490_v4, 0.0 }
 0x110   : > { %572 = vst [vmem:[%s1061_s4 + $0x38] sm:$0xff] %v540_v5  ;;  %588 = vst [vmem:[%s1061_s4 + $0xb8] sm:$0xff] %v556_v6 }
 0x111   : > { %570 = vst [vmem:[%s1061_s4 + $0x28] sm:$0xff] %v538_v7  ;;  %586 = vst [vmem:[%s1061_s4 + $0xa8] sm:$0xff] %v554_v8  ;;  %v761_v9 = vpop.f32.mrb[8].mxu0  ;;  %v777_v10 = vpop.f32.mrb[8].mxu1 }
 0x112   : > { %v447_v11 = vadd.f32 %v761_v9, %v1049_v24  ;;  %v511_v12 = vadd.f32 %v777_v10, %v1049_v24  ;;  %v438_v13 = vpop.f32.mrb[9].mxu0  ;;  %v502_v14 = vpop.f32.mrb[9].mxu1 }
 0x113   : > { %v439_v15 = vadd.f32 %v1049_v24, %v438_v13  ;;  %v503_v16 = vadd.f32 %v1049_v24, %v502_v14  ;;  %v762_v17 = vpop.f32.mrb[10].mxu0  ;;  %v778_v18 = vpop.f32.mrb[10].mxu1 }
 0x114   : > { %v543_v19 = vmax.f32 %v447_v11, 0.0  ;;  %v559_v20 = vmax.f32 %v511_v12, 0.0  ;;  %v450_v21 = vadd.f32 %v762_v17, %v1049_v24  ;;  %v514_v22 = vadd.f32 %v778_v18, %v1049_v24  ;;  %v441_v23 = vpop.f32.mrb[11].mxu0  ;;  %v505_v25 = vpop.f32.mrb[11].mxu1 }
 0x115   : > { %v541_v26 = vmax.f32 %v439_v15, 0.0  ;;  %v557_v27 = vmax.f32 %v503_v16, 0.0  ;;  %v442_v28 = vadd.f32 %v1049_v24, %v441_v23  ;;  %v506_v29 = vadd.f32 %v1049_v24, %v505_v25 }
 0x116   : > { %575 = vst [vmem:[%s1061_s4 + $0x50] sm:$0xff] %v543_v19  ;;  %591 = vst [vmem:[%s1061_s4 + $0xd0] sm:$0xff] %v559_v20  ;;  %v544_v30 = vmax.f32 %v450_v21, 0.0  ;;  %v560_v31 = vmax.f32 %v514_v22, 0.0 }
 0x117   : > { %573 = vst [vmem:[%s1061_s4 + $0x40] sm:$0xff] %v541_v26  ;;  %589 = vst [vmem:[%s1061_s4 + $0xc0] sm:$0xff] %v557_v27  ;;  %v542_v32 = vmax.f32 %v442_v28, 0.0  ;;  %v558_v33 = vmax.f32 %v506_v29, 0.0 }
 0x118   : > { %576 = vst [vmem:[%s1061_s4 + $0x58] sm:$0xff] %v544_v30  ;;  %592 = vst [vmem:[%s1061_s4 + $0xd8] sm:$0xff] %v560_v31 }
 0x119   : > { %574 = vst [vmem:[%s1061_s4 + $0x48] sm:$0xff] %v542_v32  ;;  %590 = vst [vmem:[%s1061_s4 + $0xc8] sm:$0xff] %v558_v33  ;;  %v765_v34 = vpop.f32.mrb[12].mxu0  ;;  %v781_v35 = vpop.f32.mrb[12].mxu1 }
 0x11a   : > { %v463_v36 = vadd.f32 %v765_v34, %v1049_v24  ;;  %v527_v37 = vadd.f32 %v781_v35, %v1049_v24  ;;  %v454_v38 = vpop.f32.mrb[13].mxu0  ;;  %v518_v39 = vpop.f32.mrb[13].mxu1 }
 0x11b   : > { %v455_v40 = vadd.f32 %v1049_v24, %v454_v38  ;;  %v519_v41 = vadd.f32 %v1049_v24, %v518_v39  ;;  %v766_v42 = vpop.f32.mrb[14].mxu0  ;;  %v782_v43 = vpop.f32.mrb[14].mxu1 }
 0x11c   : > { %v547_v44 = vmax.f32 %v463_v36, 0.0  ;;  %v563_v45 = vmax.f32 %v527_v37, 0.0  ;;  %v466_v46 = vadd.f32 %v766_v42, %v1049_v24  ;;  %v530_v47 = vadd.f32 %v782_v43, %v1049_v24  ;;  %v457_v48 = vpop.f32.mrb[15].mxu0  ;;  %v521_v49 = vpop.f32.mrb[15].mxu1 }
 0x11d   : > { %v545_v50 = vmax.f32 %v455_v40, 0.0  ;;  %v561_v51 = vmax.f32 %v519_v41, 0.0  ;;  %v458_v52 = vadd.f32 %v1049_v24, %v457_v48  ;;  %v522_v53 = vadd.f32 %v1049_v24, %v521_v49 }
 0x11e   : > { %579 = vst [vmem:[%s1061_s4 + $0x70] sm:$0xff] %v547_v44  ;;  %595 = vst [vmem:[%s1061_s4 + $0xf0] sm:$0xff] %v563_v45  ;;  %v548_v54 = vmax.f32 %v466_v46, 0.0  ;;  %v564_v55 = vmax.f32 %v530_v47, 0.0 }
 0x11f   : > { %577 = vst [vmem:[%s1061_s4 + $0x60] sm:$0xff] %v545_v50  ;;  %593 = vst [vmem:[%s1061_s4 + $0xe0] sm:$0xff] %v561_v51  ;;  %v546_v56 = vmax.f32 %v458_v52, 0.0  ;;  %v562_v57 = vmax.f32 %v522_v53, 0.0 }
 0x120   : > { %580 = vst [vmem:[%s1061_s4 + $0x78] sm:$0xff] %v548_v54  ;;  %596 = vst [vmem:[%s1061_s4 + $0xf8] sm:$0xff] %v564_v55 }
 0x121   : > { %578 = vst [vmem:[%s1061_s4 + $0x68] sm:$0xff] %v546_v56  ;;  %594 = vst [vmem:[%s1061_s4 + $0xe8] sm:$0xff] %v562_v57 }
 0x122   : > { %877 = shalt.err (!%p874_p3)
}
 0x123   : > { %s878_s20 = scalar_lea.hbm %s1118_s8, 4096  ;;  %s882_s26 = scalar_lea.hbm %s1174_s3, 8192 }
 0x124   : > { %p879_p4 = scmp.ne.s32.totalorder %s1118_s8, %s878_s20  ;;  %p883_p9 = scmp.lt.u32.totalorder %s1118_s8, %s1174_s3 }
 0x125   : > { %p884_p10 = scmp.lt.u32.totalorder %s882_s26, %s878_s20  ;;  %p886_p12 = scmp.lt.u32.totalorder %s878_s20, %s1118_s8 }
 0x126   : > { %p880_p7 = pnand %p879_p4, %p989_p5 }
 0x127   : > { %p885_p11 = por %p884_p10, %p883_p9 }
 0x128   : > { %p881_p8 = pneg %p880_p7 }
 0x129   : > { %p887_p13 = por %p886_p12, %p885_p11 }
 0x12b   : > { %p888_p0 = pnand %p887_p13, %p881_p8 }
 0x12d   : > { %891 = shalt.err (!%p888_p0)
}
 0x12e   : > { %s929_s29 = smov 128   ;;  %s930_s30 = smov 8  }
 0x12f   : > { %799 = dma.vmem_to_hbm [thread:$0]  (%p989_p5), %s1120_s6, 4096, %s1118_s8, %s1130_s9, %s929_s29, %s929_s29, %s930_s30  }
 0x130 PF: > { %p805_p1 = scmp.ge.s32.totalorder %s926_s15, 2  ;;  %s626_s4 = sand.u32 1, %s914_s12  }
 0x131   : > { %s627_s5 = scalar_lea.sflag [#allocation3], %s626_s4 }
 0x132   : > { %p802_p2 = pnand %p805_p1, %p993_p6 }
 0x134   : > { %909 = dma.done.wait (!%p802_p2), %s627_s5, 4096  }
 0x135   : > { %911 = vsyncadd (!%p802_p2), %s627_s5, 4294963200  ;;  %p13_p3 = scmp.ge.s32.totalorder %s976_s18, 4   ;;  %s1177_s12 = smov %s918_s13 }
 0x136   : > { %s1178_s13 = smov %s922_s14  ;;  %s1179_s14 = smov %s987_s21 }
 0x137   : > { %s1180_s15 = smov %s976_s18  ;;  %15 = sbr.rel (!%p13_p3) target bundleno = 3 (0x3), region = 67 }
 0x13e   :  { %632 = vsyncpa [#allocation3], 1 }
 0x13f   :  { %634 = vsyncpa [#allocation3 + $0x1], 1 }

</bundles_post_ra>
